<compile_context>
chip_gen: v6e
topology: v6e:2x2x1
jax: 0.10.0
libtpu: 0.0.40
codegen_flags: <defaults>
</compile_context>

<pallas_src>
import functools
import math

import jax
import jax.numpy as jnp
from jax.experimental import pallas as pl
from jax.experimental.pallas import tpu as pltpu


def _round_up(n, m):
    return ((n + m - 1) // m) * m


def _vmem_capacity_bytes(default=64 * 1024 * 1024):
    """Per-generation VMEM size (v5e/v6e: 128 MiB, v7x: 64 MiB per TC)."""
    try:
        info = pltpu.get_tpu_info()
        return int(getattr(info, "vmem_capacity_bytes", default))
    except Exception:
        return default


def _mlp_kernel(x_ref, w1_ref, b1_ref, w2_ref, b2_ref, w3_ref, b3_ref, o_ref, *, chunk):
    # x_ref: [in_dim, TB]  (features on sublanes, batch on lanes)
    # Weights stay resident (constant index_map); load them to vregs once.
    w1 = w1_ref[...]
    b1 = b1_ref[...]
    w2 = w2_ref[...]
    b2 = b2_ref[...]
    w3 = w3_ref[...]
    b3 = b3_ref[...]

    n_chunks = x_ref.shape[1] // chunk  # static

    def body(c, carry):
        off = pl.multiple_of(c * chunk, 128)
        x = x_ref[:, pl.ds(off, chunk)]                 # [in, chunk]

        # Layer 1: [h1, in] @ [in, chunk] + [h1, 1] -> ReLU   (stays in vregs)
        h1 = jnp.dot(w1, x, preferred_element_type=jnp.float32) + b1
        h1 = jnp.maximum(h1, 0.0)

        # Layer 2: [h2, h1] @ [h1, chunk] + [h2, 1] -> ReLU   (stays in vregs)
        h2 = jnp.dot(w2, h1, preferred_element_type=jnp.float32) + b2
        h2 = jnp.maximum(h2, 0.0)

        # Layer 3: [out, h2] @ [h2, chunk] + [out, 1]   (lane-dense store)
        out = jnp.dot(w3, h2, preferred_element_type=jnp.float32) + b3
        o_ref[:, pl.ds(off, chunk)] = out.astype(o_ref.dtype)
        return carry

    jax.lax.fori_loop(0, n_chunks, body, 0, unroll=True)


def weight_regressor_forward(x, params, *, block_batch=32768, chunk=512,
                             feature_major=False):
    """x: [batch, input_dim] f32 (or [input_dim, batch] if feature_major=True).
    params: PyTorch-layout weights ([out, in]) and biases ([out, 1])."""
    w1, b1 = params["w1"], params["b1"]
    w2, b2 = params["w2"], params["b2"]
    w3, b3 = params["w3"], params["b3"]

    if feature_major:
        x_t = x
        in_dim, batch = x.shape
    else:
        batch, in_dim = x.shape
        # Single XLA pass (no separate pad pass).  Feature-major is the right
        # kernel layout: a natural-layout [batch, 3] block would pad 3 lanes to
        # 128 (42x DMA waste).  Provide feature_major inputs upstream to remove
        # even this pass.
        x_t = x.T

    out_dim = w3.shape[0]
    h1_dim, h2_dim = w1.shape[0], w2.shape[0]

    # ---- tile sizing (per-generation VMEM aware) ---------------------------
    vmem_cap = _vmem_capacity_bytes()
    vmem_limit = min(64 * 1024 * 1024, (vmem_cap * 3) // 4)
    # VMEM per batch element: x block + out block (sublane-padded f32, double-buffered).
    per_elem = 4 * 2 * (_round_up(in_dim, 8) + _round_up(out_dim, 8))
    max_tb = max(chunk, ((vmem_limit // 2) // per_elem) // chunk * chunk)

    tb = max(chunk, min(_round_up(block_batch, chunk),
                        _round_up(batch, chunk),
                        max_tb))
    grid = (pl.cdiv(batch, tb),)  # ragged final block handled by Pallas masking

    flops = 2 * batch * (in_dim * h1_dim + h1_dim * h2_dim + h2_dim * out_dim)
    bytes_accessed = 4 * (
        batch * (in_dim + out_dim)
        + w1.size + b1.size + w2.size + b2.size + w3.size + b3.size
    )

    const = lambda i: (0, 0)  # weights/biases stay resident, never re-DMA'd
    out_t = pl.pallas_call(
        functools.partial(_mlp_kernel, chunk=chunk),
        out_shape=jax.ShapeDtypeStruct((out_dim, batch), x.dtype),
        grid=grid,
        in_specs=[
            pl.BlockSpec((in_dim, tb), lambda i: (0, i)),   # streamed x tile, lane-dense
            pl.BlockSpec(w1.shape, const),
            pl.BlockSpec(b1.shape, const),
            pl.BlockSpec(w2.shape, const),
            pl.BlockSpec(b2.shape, const),
            pl.BlockSpec(w3.shape, const),
            pl.BlockSpec(b3.shape, const),
        ],
        out_specs=pl.BlockSpec((out_dim, tb), lambda i: (0, i)),  # [1, TB] stores
        compiler_params=pltpu.CompilerParams(
            # TODO(synk): on v7x, if the profile shows only one TensorCore busy,
            # add a leading size-2 grid axis with pltpu.CORE_PARALLEL and split
            # the batch blocks between cores.
            dimension_semantics=("parallel",),
            vmem_limit_bytes=vmem_limit,
        ),
        cost_estimate=pl.CostEstimate(
            flops=flops, transcendentals=0, bytes_accessed=bytes_accessed
        ),
    )(x_t, w1, b1, w2, b2, w3, b3)

    # [out_dim, batch] -> [batch, out_dim] without an XLA transpose pass.
    if out_dim == 1:
        return out_t.reshape(batch, 1)
    return out_t.T


def init_params(key, input_dim=3, hidden_dim=16, output_dim=1):
    """PyTorch nn.Linear-style init: W ~ U(+/-1/sqrt(fan_in)), W [out, in], b [out, 1]."""
    dims = [
        (input_dim, hidden_dim),
        (hidden_dim, hidden_dim * 2),
        (hidden_dim * 2, output_dim),
    ]
    params = {}
    for idx, (fan_in, fan_out) in enumerate(dims, start=1):
        key, kw, kb = jax.random.split(key, 3)
        bound = 1.0 / math.sqrt(fan_in)
        params[f"w{idx}"] = jax.random.uniform(
            kw, (fan_out, fan_in), dtype=jnp.float32, minval=-bound, maxval=bound
        )
        params[f"b{idx}"] = jax.random.uniform(
            kb, (fan_out, 1), dtype=jnp.float32, minval=-bound, maxval=bound
        )
    return params


def reference_forward(x, params):
    h1 = jnp.maximum(x @ params["w1"].T + params["b1"][:, 0], 0.0)
    h2 = jnp.maximum(h1 @ params["w2"].T + params["b2"][:, 0], 0.0)
    return h2 @ params["w3"].T + params["b3"][:, 0]


if __name__ == "__main__":
    key = jax.random.PRNGKey(0)
    key, kx = jax.random.split(key)

    # Small, deliberately non-128-aligned batch to exercise the ragged tail block.
    batch, input_dim, hidden_dim, output_dim = 200, 3, 16, 1
    x = jax.random.normal(kx, (batch, input_dim), dtype=jnp.float32)
    params = init_params(key, input_dim, hidden_dim, output_dim)

    out = weight_regressor_forward(x, params)
    out = jax.block_until_ready(out)

    ref = reference_forward(x, params)
    assert out.shape == (batch, output_dim), out.shape
    assert jnp.allclose(out, ref, atol=1e-5, rtol=1e-5), "mismatch vs pure-JAX reference"

    print("KERNEL_OK")
</pallas_src>

<mosaic_0001>
module attributes {stable_mosaic.version = 11 : i64} {
  func.func @_mlp_kernel(%arg0: i32, %arg1: memref<3x512xf32, #tpu.memory_space<vmem>>, %arg2: memref<16x3xf32, #tpu.memory_space<vmem>>, %arg3: memref<16x1xf32, #tpu.memory_space<vmem>>, %arg4: memref<32x16xf32, #tpu.memory_space<vmem>>, %arg5: memref<32x1xf32, #tpu.memory_space<vmem>>, %arg6: memref<1x32xf32, #tpu.memory_space<vmem>>, %arg7: memref<1x1xf32, #tpu.memory_space<vmem>>, %arg8: memref<1x512xf32, #tpu.memory_space<vmem>>) attributes {dimension_semantics = [#tpu.dimension_semantics<parallel>], iteration_bounds = array<i64: 1>, scalar_prefetch = 0 : i64, scratch_operands = 0 : i64, tpu.core_type = #tpu.core_type<tc>, window_params = [{transform_indices = @transform_0, window_bounds = array<i64: 3, 512>}, {pipeline_mode = #tpu.pipeline_mode<synchronous>, transform_indices = @transform_1, window_bounds = array<i64: 16, 3>}, {pipeline_mode = #tpu.pipeline_mode<synchronous>, transform_indices = @transform_2, window_bounds = array<i64: 16, 1>}, {pipeline_mode = #tpu.pipeline_mode<synchronous>, transform_indices = @transform_3, window_bounds = array<i64: 32, 16>}, {pipeline_mode = #tpu.pipeline_mode<synchronous>, transform_indices = @transform_4, window_bounds = array<i64: 32, 1>}, {pipeline_mode = #tpu.pipeline_mode<synchronous>, transform_indices = @transform_5, window_bounds = array<i64: 1, 32>}, {pipeline_mode = #tpu.pipeline_mode<synchronous>, transform_indices = @transform_6, window_bounds = array<i64: 1, 1>}, {transform_indices = @transform_7, window_bounds = array<i64: 1, 512>}]} {
    %c0 = arith.constant 0 : index
    %c0_0 = arith.constant 0 : index
    %0 = vector.load %arg2[%c0, %c0_0] : memref<16x3xf32, #tpu.memory_space<vmem>>, vector<16x3xf32>
    %c0_1 = arith.constant 0 : index
    %c0_2 = arith.constant 0 : index
    %1 = vector.load %arg3[%c0_1, %c0_2] : memref<16x1xf32, #tpu.memory_space<vmem>>, vector<16x1xf32>
    %c0_3 = arith.constant 0 : index
    %c0_4 = arith.constant 0 : index
    %2 = vector.load %arg4[%c0_3, %c0_4] : memref<32x16xf32, #tpu.memory_space<vmem>>, vector<32x16xf32>
    %c0_5 = arith.constant 0 : index
    %c0_6 = arith.constant 0 : index
    %3 = vector.load %arg5[%c0_5, %c0_6] : memref<32x1xf32, #tpu.memory_space<vmem>>, vector<32x1xf32>
    %c0_7 = arith.constant 0 : index
    %c0_8 = arith.constant 0 : index
    %4 = vector.load %arg6[%c0_7, %c0_8] : memref<1x32xf32, #tpu.memory_space<vmem>>, vector<1x32xf32>
    %c0_9 = arith.constant 0 : index
    %c0_10 = arith.constant 0 : index
    %5 = vector.load %arg7[%c0_9, %c0_10] : memref<1x1xf32, #tpu.memory_space<vmem>>, vector<1x1xf32>
    %c0_i32 = arith.constant 0 : i32
    %c512_i32 = arith.constant 512 : i32
    %6 = arith.muli %c0_i32, %c512_i32 : i32
    %7 = tpu.assume_multiple %6, 128 : i32
    %c0_11 = arith.constant 0 : index
    %8 = arith.index_cast %7 : i32 to index
    %9 = vector.load %arg1[%c0_11, %8] : memref<3x512xf32, #tpu.memory_space<vmem>>, vector<3x512xf32>
    %cst = arith.constant dense<0.000000e+00> : vector<16x512xf32>
    %10 = tpu.matmul %0, %9, %cst {dimension_numbers = #tpu.dot_dimension_numbers<[1], [0], [0], [1], [0, 0, 1, 1], [], []>} : vector<16x3xf32>, vector<3x512xf32>, vector<16x512xf32> -> vector<16x512xf32>
    %11 = vector.broadcast %1 : vector<16x1xf32> to vector<16x512xf32>
    %12 = arith.addf %10, %11 : vector<16x512xf32>
    %cst_12 = arith.constant 0.000000e+00 : f32
    %13 = vector.broadcast %cst_12 : f32 to vector<16x512xf32>
    %14 = arith.maximumf %12, %13 : vector<16x512xf32>
    %cst_13 = arith.constant dense<0.000000e+00> : vector<32x512xf32>
    %15 = tpu.matmul %2, %14, %cst_13 {dimension_numbers = #tpu.dot_dimension_numbers<[1], [0], [0], [1], [0, 0, 1, 1], [], []>} : vector<32x16xf32>, vector<16x512xf32>, vector<32x512xf32> -> vector<32x512xf32>
    %16 = vector.broadcast %3 : vector<32x1xf32> to vector<32x512xf32>
    %17 = arith.addf %15, %16 : vector<32x512xf32>
    %cst_14 = arith.constant 0.000000e+00 : f32
    %18 = vector.broadcast %cst_14 : f32 to vector<32x512xf32>
    %19 = arith.maximumf %17, %18 : vector<32x512xf32>
    %cst_15 = arith.constant dense<0.000000e+00> : vector<1x512xf32>
    %20 = tpu.matmul %4, %19, %cst_15 {dimension_numbers = #tpu.dot_dimension_numbers<[1], [0], [0], [1], [0, 0, 1, 1], [], []>} : vector<1x32xf32>, vector<32x512xf32>, vector<1x512xf32> -> vector<1x512xf32>
    %21 = vector.broadcast %5 : vector<1x1xf32> to vector<1x512xf32>
    %22 = arith.addf %20, %21 : vector<1x512xf32>
    %c0_16 = arith.constant 0 : index
    %23 = arith.index_cast %7 : i32 to index
    %24 = vector.load %arg8[%c0_16, %23] : memref<1x512xf32, #tpu.memory_space<vmem>>, vector<1x512xf32>
    tpu.vector_store %arg8[%c0_16, %23], %22 {strides = array<i32>} : memref<1x512xf32, #tpu.memory_space<vmem>>, vector<1x512xf32>,
    %c1_i32 = arith.constant 1 : i32
    return
  }
  func.func @transform_0(%arg0: i32) -> (i32, i32) {
    %c0_i32 = arith.constant 0 : i32
    %c0_i32_0 = arith.constant 0 : i32
    return %c0_i32, %arg0 : i32, i32
  }
  func.func @transform_1(%arg0: i32) -> (i32, i32) {
    %c0_i32 = arith.constant 0 : i32
    %c0_i32_0 = arith.constant 0 : i32
    %c0_i32_1 = arith.constant 0 : i32
    return %c0_i32, %c0_i32_0 : i32, i32
  }
  func.func @transform_2(%arg0: i32) -> (i32, i32) {
    %c0_i32 = arith.constant 0 : i32
    %c0_i32_0 = arith.constant 0 : i32
    %c0_i32_1 = arith.constant 0 : i32
    return %c0_i32, %c0_i32_0 : i32, i32
  }
  func.func @transform_3(%arg0: i32) -> (i32, i32) {
    %c0_i32 = arith.constant 0 : i32
    %c0_i32_0 = arith.constant 0 : i32
    %c0_i32_1 = arith.constant 0 : i32
    return %c0_i32, %c0_i32_0 : i32, i32
  }
  func.func @transform_4(%arg0: i32) -> (i32, i32) {
    %c0_i32 = arith.constant 0 : i32
    %c0_i32_0 = arith.constant 0 : i32
    %c0_i32_1 = arith.constant 0 : i32
    return %c0_i32, %c0_i32_0 : i32, i32
  }
  func.func @transform_5(%arg0: i32) -> (i32, i32) {
    %c0_i32 = arith.constant 0 : i32
    %c0_i32_0 = arith.constant 0 : i32
    %c0_i32_1 = arith.constant 0 : i32
    return %c0_i32, %c0_i32_0 : i32, i32
  }
  func.func @transform_6(%arg0: i32) -> (i32, i32) {
    %c0_i32 = arith.constant 0 : i32
    %c0_i32_0 = arith.constant 0 : i32
    %c0_i32_1 = arith.constant 0 : i32
    return %c0_i32, %c0_i32_0 : i32, i32
  }
  func.func @transform_7(%arg0: i32) -> (i32, i32) {
    %c0_i32 = arith.constant 0 : i32
    %c0_i32_0 = arith.constant 0 : i32
    return %c0_i32, %arg0 : i32, i32
  }
}

</mosaic_0001>

<bundles_post_ra>
// kernel: tpu_custom_call.1
= control target key start
LH: loop header
LB: loop body
LE: loop exit
PB: predicated region body
PF: predicated region fallthrough
CT: control target
= control target key end

     0   :  { %s840_s0 = inlined_call_operand.vmem [shape: f32[3,200], index: 0, kind: input, shape index: {}]   ;;  %s841_s1 = inlined_call_operand.vmem [shape: f32[16,3], index: 1, kind: input, shape index: {}]   ;;  %s842_s2 = inlined_call_operand.vmem [shape: f32[16,1], index: 2, kind: input, shape index: {}]   ;;  %s843_s3 = inlined_call_operand.vmem [shape: f32[32,16], index: 3, kind: input, shape index: {}]   ;;  %s844_s4 = inlined_call_operand.vmem [shape: f32[32,1], index: 4, kind: input, shape index: {}]   ;;  %s845_s5 = inlined_call_operand.vmem [shape: f32[1,32], index: 5, kind: input, shape index: {}]   ;;  %s846_s6 = inlined_call_operand.<no memory space> [shape: f32[1,1], index: 6, kind: input, shape index: {}]   ;;  %s847_s7 = inlined_call_operand.hbm [shape: f32[1,200], index: 7, kind: output, shape index: {}]  }
   0x1   :  { %v12_v0 = vstv %s846_s6 }
   0x2   :  { %13 = vst [vmem:[#allocation2] sm:$0x1] %v12_v0 }
   0x3   :  { %14 = vsyncpa [#allocation4], 0  ;;  %v43_v1 = vld [vmem:[%s840_s0] sm:$0x77]  ;;  %vm66_vm0 = vcmask 1042432   ;;  %v715_v4 = vmov 0.0  }
   0x4   :  { %v57_v2 = vcombine.high %v43_v1, %v43_v1  ;;  %v44_v3 = vld [vmem:[%s840_s0 + $0x8] sm:$0x77]  ;;  %139 = vmatprep.mubr.f32.mxu0 %v715_v4  ;;  %216 = vmatprep.mubr.f32.mxu1 %v715_v4  ;;  %v29_v6 = vld [vmem:[%s841_s1] sm:$0xff]  ;;  %vm59_vm1 = vcmask 23552   ;;  %v716_v7 = vmov 0   ;;  %v40_v13 = vld [vmem:[%s844_s4 + $0x18] sm:$0xff] }
   0x5   :  { %v58_v5 = vcombine.high %v44_v3, %v44_v3  ;;  %689 = vset.pattern.permute.xlu0 %v716_v7  ;;  %v32_v8 = vld [vmem:[%s842_s2 + $0x8] sm:$0xff]  ;;  %690 = vset.pattern.permute.xlu1 %v716_v7  ;;  %v31_v9 = vld [vmem:[%s842_s2] sm:$0xff]  ;;  %v39_v14 = vld [vmem:[%s844_s4 + $0x10] sm:$0xff]  ;;  %vm257_vm2 = vcmask 130048   ;;  %vm473_vm3 = vcmask 261120  }
   0x6   :  { %667 = vmatprep.subr.msk.mxu0 %vm66_vm0, %v57_v2  ;;  %52 = vperm.xlu0 %689, %v32_v8   ;;  %v30_v10 = vld [vmem:[%s841_s1 + $0x8] sm:$0xff]  ;;  %v37_v15 = vld [vmem:[%s844_s4] sm:$0xff]  ;;  %v35_v44 = vld [vmem:[%s843_s3 + $0x10] sm:$0xff] }
   0x7   :  { %671 = vmatprep.subr.msk.mxu1 %vm66_vm0, %v58_v5  ;;  %668 = vmatpush1.msk.msra.mxu0 %vm66_vm0, %v43_v1  ;;  %v38_v11 = vld [vmem:[%s844_s4 + $0x8] sm:$0xff]  ;;  %v33_v41 = vld [vmem:[%s843_s3] sm:$0xff]  ;;  %v36_v45 = vld [vmem:[%s843_s3 + $0x18] sm:$0xff] }
   0x8   :  { %672 = vmatpush1.msk.msra.mxu1 %vm66_vm0, %v44_v3  ;;  %669 = vmatmul.mubr.msk.f32.vlgmr.msra.gmra.mxu0 %vm59_vm1, %v29_v6  ;;  %v34_v43 = vld [vmem:[%s843_s3 + $0x8] sm:$0xff] }
   0x9   :  { %673 = vmatmul.mubr.msk.f32.vlgmr.msra.gmra.mxu1 %vm59_vm1, %v29_v6  ;;  %145 = vmatprep.mubr.f32.mxu0 %v715_v4  ;;  %v42_v12 = vld [vmem:[#allocation2] sm:$0x1] }
   0xa   :  { %222 = vmatprep.mubr.f32.mxu1 %v715_v4  ;;  %47 = vperm.xlu0 %689, %v31_v9  }
   0xb   :  { %254 = vperm.xlu1 %690, %v40_v13  }
   0xc   :  { %670 = vmatmul.mubr.msk.f32.gmra.mxu0 %vm59_vm1, %v30_v10 }
   0xd   :  { %674 = vmatmul.mubr.msk.f32.gmra.mxu1 %vm59_vm1, %v30_v10  ;;  %334 = vmatprep.mubr.f32.mxu0 %v715_v4 }
   0xe   :  { %244 = vperm.xlu0 %689, %v38_v11   ;;  %423 = vmatprep.mubr.f32.mxu1 %v715_v4 }
   0xf   :  { %249 = vperm.xlu1 %690, %v39_v14  }
  0x12   :  { %466 = vperm.xlu0 %689, %v42_v12  }
  0x13   :  { %239 = vperm.xlu1 %690, %v37_v15  }
  0x81   :  { %v53_v16 = vpop.permute.xlu0 %52 }
  0x85   :  { %v48_v23 = vpop.permute.xlu0 %47 }
  0x86   :  { %v255_v51 = vpop.permute.xlu1 %254 }
  0x8a   :  { %v250_v58 = vpop.permute.xlu1 %249 }
  0x8e   :  { %v240_v8 = vpop.permute.xlu1 %239 }
  0xc8   :  { %v141_v17 = vpop.f32.mrf.mxu0 }
  0xc9   :  { %v218_v18 = vpop.f32.mrf.mxu1  ;;  %v142_v30 = vadd.f32 %v141_v17, %v48_v23 }
  0xca   :  { %v143_v19 = vpop.f32.mrf.mxu0  ;;  %v219_v33 = vadd.f32 %v218_v18, %v48_v23 }
  0xcb   :  { %v220_v20 = vpop.f32.mrf.mxu1  ;;  %v144_v26 = vadd.f32 %v143_v19, %v48_v23  ;;  %v229_v39 = vmax.f32 %v142_v30, 0.0 }
  0xcc   :  { %v147_v21 = vpop.f32.mrf.mxu0  ;;  %v221_v31 = vadd.f32 %v220_v20, %v48_v23  ;;  %v231_v42 = vmax.f32 %v219_v33, 0.0  ;;  %v41_v33 = vld [vmem:[%s845_s5] sm:$0x1] }
  0xcd   :  { %v224_v22 = vpop.f32.mrf.mxu1  ;;  %v148_v24 = vadd.f32 %v147_v21, %v53_v16  ;;  %v230_v37 = vmax.f32 %v144_v26, 0.0 }
  0xce   :  { %v149_v25 = vpop.f32.mrf.mxu0  ;;  %v225_v27 = vadd.f32 %v224_v22, %v53_v16  ;;  %v232_v40 = vmax.f32 %v221_v31, 0.0 }
  0xcf   :  { %v150_v28 = vadd.f32 %v149_v25, %v53_v16  ;;  %v226_v29 = vpop.f32.mrf.mxu1  ;;  %v233_v35 = vmax.f32 %v148_v24, 0.0 }
  0xd0   :  { %v227_v32 = vadd.f32 %v226_v29, %v53_v16  ;;  %v235_v38 = vmax.f32 %v225_v27, 0.0 }
  0xd1   :  { %v234_v34 = vmax.f32 %v150_v28, 0.0 }
  0xd2   :  { %v236_v36 = vmax.f32 %v227_v32, 0.0 }
  0xd3   :  { %298 = vmatprep.subr.mxu0 %v234_v34 }
  0xd4   :  { %387 = vmatprep.subr.mxu1 %v236_v36  ;;  %299 = vmatpush1.msra.mxu0 %v233_v35  ;;  %v469_v35 = vlaneseq }
  0xd5   :  { %388 = vmatpush1.msra.mxu1 %v235_v38  ;;  %300 = vmatprep.subr.mxu0 %v230_v37  ;;  %v717_v37 = vmov 1966171168  }
  0xd6   :  { %389 = vmatprep.subr.mxu1 %v232_v40  ;;  %301 = vmatpush1.msra.mxu0 %v229_v39  ;;  %v470_v36 = vshrl.u32 %v469_v35, 7  ;;  %v626_v38 = vunpack.c.l.s4 %v717_v37  ;;  %vm650_vm4 = vcmp.lt.s32.totalorder %v469_v35, 512 }
  0xd7   :  { %390 = vmatpush1.msra.mxu1 %v231_v42  ;;  %675 = vmatmul.mubr.msk.f32.vlgmr.msra.gmra.mxu0 %vm257_vm2, %v33_v41 }
  0xd8   :  { %679 = vmatmul.mubr.msk.f32.vlgmr.msra.gmra.mxu1 %vm257_vm2, %v33_v41  ;;  %340 = vmatprep.mubr.f32.mxu0 %v715_v4  ;;  %v471_v39 = vsub.s32 0, %v470_v36  ;;  %v627_v41 = vunpack.c.0.s8 %v626_v38 }
  0xd9   :  { %429 = vmatprep.mubr.f32.mxu1 %v715_v4 }
  0xdb   :  { %676 = vmatmul.mubr.msk.f32.gmra.mxu0 %vm257_vm2, %v34_v43 }
  0xdc   :  { %680 = vmatmul.mubr.msk.f32.gmra.mxu1 %vm257_vm2, %v34_v43  ;;  %346 = vmatprep.mubr.f32.mxu0 %v715_v4 }
  0xdd   :  { %435 = vmatprep.mubr.f32.mxu1 %v715_v4 }
  0xdf   :  { %677 = vmatmul.mubr.msk.f32.gmra.mxu0 %vm257_vm2, %v35_v44 }
  0xe0   :  { %681 = vmatmul.mubr.msk.f32.gmra.mxu1 %vm257_vm2, %v35_v44  ;;  %352 = vmatprep.mubr.f32.mxu0 %v715_v4 }
  0xe1   :  { %441 = vmatprep.mubr.f32.mxu1 %v715_v4 }
  0xe3   :  { %678 = vmatmul.mubr.msk.f32.gmra.mxu0 %vm257_vm2, %v36_v45 }
  0xe4   :  { %682 = vmatmul.mubr.msk.f32.gmra.mxu1 %vm257_vm2, %v36_v45  ;;  %541 = vmatprep.mubr.f32.mxu0 %v715_v4 }
  0xe5   :  { %612 = vmatprep.mubr.f32.mxu1 %v715_v4  ;;  %v245_v4 = vpop.permute.xlu0 %244 }
  0xe9   :  { %v467_v40 = vpop.permute.xlu0 %466 }
  0xea   :  { %v472_v43 = vrot.slane %v467_v40, %v471_v39 }
 0x197   :  { %v336_v46 = vpop.f32.mrf.mxu0 }
 0x198   :  { %v425_v47 = vpop.f32.mrf.mxu1  ;;  %v337_v20 = vadd.f32 %v336_v46, %v240_v8  ;;  %v630_v46 = vsub.s32 %v627_v41, %v470_v36 }
 0x199   :  { %v338_v48 = vpop.f32.mrf.mxu0  ;;  %v426_v24 = vadd.f32 %v425_v47, %v240_v8 }
 0x19a   :  { %v427_v49 = vpop.f32.mrf.mxu1  ;;  %v339_v16 = vadd.f32 %v338_v48, %v240_v8  ;;  %v448_v31 = vmax.f32 %v337_v20, 0.0 }
 0x19b   :  { %v342_v50 = vpop.f32.mrf.mxu0  ;;  %v428_v21 = vadd.f32 %v427_v49, %v240_v8  ;;  %v450_v34 = vmax.f32 %v426_v24, 0.0 }
 0x19c   :  { %v431_v52 = vpop.f32.mrf.mxu1  ;;  %v343_v12 = vadd.f32 %v342_v50, %v245_v4  ;;  %v449_v29 = vmax.f32 %v339_v16, 0.0 }
 0x19d   :  { %v344_v53 = vpop.f32.mrf.mxu0  ;;  %v432_v17 = vadd.f32 %v431_v52, %v245_v4  ;;  %v451_v32 = vmax.f32 %v428_v21, 0.0 }
 0x19e   :  { %v433_v54 = vpop.f32.mrf.mxu1  ;;  %v345_v9 = vadd.f32 %v344_v53, %v245_v4  ;;  %v452_v27 = vmax.f32 %v343_v12, 0.0 }
 0x19f   :  { %v348_v55 = vpop.f32.mrf.mxu0  ;;  %v434_v13 = vadd.f32 %v433_v54, %v245_v4  ;;  %v454_v30 = vmax.f32 %v432_v17, 0.0 }
 0x1a0   :  { %v437_v56 = vpop.f32.mrf.mxu1  ;;  %v349_v5 = vadd.f32 %v348_v55, %v250_v58  ;;  %v453_v25 = vmax.f32 %v345_v9, 0.0 }
 0x1a1   :  { %v350_v57 = vpop.f32.mrf.mxu0  ;;  %v438_v10 = vadd.f32 %v437_v56, %v250_v58  ;;  %v455_v28 = vmax.f32 %v434_v13, 0.0 }
 0x1a2   :  { %v439_v59 = vpop.f32.mrf.mxu1  ;;  %v351_v0 = vadd.f32 %v350_v57, %v250_v58  ;;  %v456_v22 = vmax.f32 %v349_v5, 0.0 }
 0x1a3   :  { %v354_v60 = vpop.f32.mrf.mxu0  ;;  %v440_v6 = vadd.f32 %v439_v59, %v250_v58  ;;  %v458_v26 = vmax.f32 %v438_v10, 0.0 }
 0x1a4   :  { %v443_v61 = vpop.f32.mrf.mxu1  ;;  %v355_v62 = vadd.f32 %v354_v60, %v255_v51  ;;  %v457_v18 = vmax.f32 %v351_v0, 0.0 }
 0x1a5   :  { %v356_v63 = vpop.f32.mrf.mxu0  ;;  %v444_v1 = vadd.f32 %v443_v61, %v255_v51  ;;  %v459_v23 = vmax.f32 %v440_v6, 0.0 }
 0x1a6   :  { %v357_v2 = vadd.f32 %v356_v63, %v255_v51  ;;  %v445_v3 = vpop.f32.mrf.mxu1  ;;  %v460_v14 = vmax.f32 %v355_v62, 0.0 }
 0x1a7   :  { %v446_v7 = vadd.f32 %v445_v3, %v255_v51  ;;  %v462_v19 = vmax.f32 %v444_v1, 0.0 }
 0x1a8   :  { %v461_v11 = vmax.f32 %v357_v2, 0.0 }
 0x1a9   :  { %v463_v15 = vmax.f32 %v446_v7, 0.0 }
 0x1aa   :  { %501 = vmatprep.subr.mxu0 %v461_v11 }
 0x1ab   :  { %572 = vmatprep.subr.mxu1 %v463_v15  ;;  %502 = vmatpush1.msra.mxu0 %v460_v14 }
 0x1ac   :  { %573 = vmatpush1.msra.mxu1 %v462_v19  ;;  %503 = vmatprep.subr.mxu0 %v457_v18 }
 0x1ad   :  { %574 = vmatprep.subr.mxu1 %v459_v23  ;;  %504 = vmatpush1.msra.mxu0 %v456_v22 }
 0x1ae   :  { %575 = vmatpush1.msra.mxu1 %v458_v26  ;;  %505 = vmatprep.subr.mxu0 %v453_v25 }
 0x1af   :  { %576 = vmatprep.subr.mxu1 %v455_v28  ;;  %506 = vmatpush1.msra.mxu0 %v452_v27 }
 0x1b0   :  { %577 = vmatpush1.msra.mxu1 %v454_v30  ;;  %507 = vmatprep.subr.mxu0 %v449_v29 }
 0x1b1   :  { %578 = vmatprep.subr.mxu1 %v451_v32  ;;  %508 = vmatpush1.msra.mxu0 %v448_v31 }
 0x1b2   :  { %579 = vmatpush1.msra.mxu1 %v450_v34  ;;  %683 = vmatmul.mubr.msk.f32.vlgmr.msra.gmra.mxu0 %vm473_vm3, %v41_v33 }
 0x1b3   :  { %684 = vmatmul.mubr.msk.f32.vlgmr.msra.gmra.mxu1 %vm473_vm3, %v41_v33 }
 0x272   :  { %v543_v42 = vpop.f32.mrf.mxu0 }
 0x273   :  { %v614_v44 = vpop.f32.mrf.mxu1  ;;  %v544_v47 = vadd.f32 %v543_v42, %v472_v43 }
 0x274   :  { %v545_v45 = vpop.f32.mrf.mxu0  ;;  %v615_v50 = vadd.f32 %v614_v44, %v472_v43 }
 0x275   :  { %v546_v48 = vadd.f32 %v545_v45, %v472_v43  ;;  %v616_v49 = vpop.f32.mrf.mxu1 }
 0x276   :  { %v617_v51 = vadd.f32 %v616_v49, %v472_v43 }
 0x277   :  { %v623_v52 = vcombine.low %v544_v47, %v546_v48 }
 0x278   :  { %v624_v53 = vcombine.low %v615_v50, %v617_v51 }
 0x279   :  { %v631_v54 = vrot.slane %v623_v52, %v630_v46 }
 0x27a   :  { %v638_v55 = vrot.slane %v624_v53, %v630_v46 }
 0x27c   :  { %v639_v56 = vcombine.low %v631_v54, %v638_v55 }
 0x27e   :  { %v646_v57 = vrot.slane %v639_v56, %v630_v46 }
 0x280   :  { %652 = vst.msk [vmem:[#allocation3] sm:$0xf] %vm650_vm4, %v646_v57 }
 0x281   :  { %657 = vsyncadd [#allocation4], 32  ;;  %s718_s5 = smov [#allocation3]  }
 0x282   :  { %s659_s27 = sshll.u32 %s718_s5, 4  ;;  %s660_s27 = int_to_ptr.vmem [resolvable:$true] %s659_s27 }
 0x283   :  { %s693_s28 = scalar_lea.vmem %s660_s27, 32  ;;  %s697_s29 = scalar_lea.vmem %s660_s27, 64 }
 0x284   :  { %p694_p0 = scmp.ne.s32.totalorder %s660_s27, %s693_s28  ;;  %p698_p1 = scmp.lt.s32.totalorder %s660_s27, %s660_s27 }
 0x285   :  { %p699_p2 = scmp.lt.s32.totalorder %s697_s29, %s693_s28 }
 0x287   :  { %p700_p3 = por %p699_p2, %p698_p1 }
 0x289   :  { %p701_p4 = pnand %p700_p3, %p694_p0 }
 0x28b   :  { %704 = shalt.err (!%p701_p4)
}
 0x28c   :  { %662 = dma.vmem_to_hbm [thread:$0]  %s660_s27, 32, %s847_s7, [#allocation4]  }
 0x28d   :  { %713 = dma.done.wait [#allocation4], 64  }
 0x28e   :  { %714 = vsyncadd [#allocation4], 4294967232 }
 0x28f   :  { %666 = vsyncpa [#allocation4], 1 }

</bundles_post_ra>
